<compile_context>
chip_gen: v6e
topology: v6e:2x2x1
jax: 0.10.0
libtpu: 0.0.40
codegen_flags: <defaults>
</compile_context>

<pallas_src>
import functools

import jax
import jax.numpy as jnp
from jax.experimental import pallas as pl
from jax.experimental.pallas import tpu as pltpu


def _round_up(x: int, m: int) -> int:
    return ((x + m - 1) // m) * m


def _vmem_capacity_bytes() -> int:
    try:
        return int(pltpu.get_tpu_info().vmem_capacity_bytes)
    except Exception:
        return 64 * 1024 * 1024  # conservative (v7x per-TC physical VMEM)


def _pad_input(x, b_pad: int, in_pad: int):
    batch, in_dim = x.shape
    x32 = x.astype(jnp.float32)
    if b_pad == batch and in_pad == in_dim:
        return x32
    return jnp.pad(x32, ((0, b_pad - batch), (0, in_pad - in_dim)))


def _apply_activation_in_kernel(h, activation: str, num_classes: int):
    """h is f32 [rows, out_pad]; padded class columns are exact zeros pre-activation."""
    if activation == "sigmoid":
        # exp on EUP, approx reciprocal on EUP -> divide is ~free next to the MXU work
        h = pl.reciprocal(1.0 + jnp.exp(-h), approx=True)
    elif activation == "softmax":
        col = jax.lax.broadcasted_iota(jnp.int32, h.shape, 1)
        valid = col < num_classes
        hm = jnp.where(valid, h, -jnp.inf)
        m = jnp.max(hm, axis=-1, keepdims=True)
        e = jnp.where(valid, jnp.exp(hm - m), 0.0)
        h = e * pl.reciprocal(jnp.sum(e, axis=-1, keepdims=True), approx=True)
    # 'linear' / 'identity': nothing to do
    return h


# --------------------------------------------------------------------------
# Fused path: one pallas_call, all layers chained in VMEM, activation fused.
# --------------------------------------------------------------------------
def _mlp_fused_kernel(*refs, n_layers: int, activation: str, num_classes: int):
    """refs = (x_ref, w0_ref, b0_ref, ..., w{L-1}_ref, b{L-1}_ref, o_ref)."""
    x_ref = refs[0]
    o_ref = refs[1 + 2 * n_layers]

    h = x_ref[...]                                     # [TB, in_pad] f32
    for i in range(n_layers):
        w = refs[1 + 2 * i][...]                       # [d_in_pad, d_out_pad] bf16
        b = refs[2 + 2 * i][...]                       # [1, d_out_pad] f32
        h = jnp.dot(h.astype(jnp.bfloat16), w,
                    preferred_element_type=jnp.float32) + b

    h = _apply_activation_in_kernel(h, activation, num_classes)
    o_ref[...] = h.astype(o_ref.dtype)


# --------------------------------------------------------------------------
# Fallback path: per-layer tiled matmul (for models whose weights exceed VMEM).
# --------------------------------------------------------------------------
def _linear_layer_kernel(x_ref, w_ref, b_ref, o_ref, acc_ref):
    k = pl.program_id(2)

    @pl.when(k == 0)
    def _():
        acc_ref[...] = jnp.zeros_like(acc_ref)

    acc_ref[...] += jnp.dot(x_ref[...].astype(jnp.bfloat16), w_ref[...],
                            preferred_element_type=jnp.float32)

    @pl.when(k == pl.num_programs(2) - 1)
    def _():
        o_ref[...] = acc_ref[...] + b_ref[...]


def _pick_tile(dim: int) -> int:
    for t in (512, 256, 128):
        if dim % t == 0:
            return t
    return dim


def _mlp_forward_layered(x, padded_params, *, activation: str, num_classes: int,
                         vmem_limit: int):
    batch, _ = x.shape
    in_pad = padded_params[0][0].shape[0]

    tm = min(256, _round_up(batch, 8))
    b_pad = _round_up(batch, tm)
    h = _pad_input(x, b_pad, in_pad)

    for (w, b) in padded_params:
        K, N = w.shape
        tk, tn = _pick_tile(K), _pick_tile(N)
        h = pl.pallas_call(
            _linear_layer_kernel,
            out_shape=jax.ShapeDtypeStruct((b_pad, N), jnp.float32),
            grid_spec=pltpu.PrefetchScalarGridSpec(
                num_scalar_prefetch=0,
                grid=(b_pad // tm, N // tn, K // tk),
                in_specs=[pl.BlockSpec((tm, tk), lambda i, j, k: (i, k)),
                          pl.BlockSpec((tk, tn), lambda i, j, k: (k, j)),
                          pl.BlockSpec((1, tn), lambda i, j, k: (0, j))],
                out_specs=pl.BlockSpec((tm, tn), lambda i, j, k: (i, j)),
                scratch_shapes=[pltpu.VMEM((tm, tn), jnp.float32)]),
            compiler_params=pltpu.CompilerParams(
                dimension_semantics=("parallel", "parallel", "arbitrary"),
                vmem_limit_bytes=vmem_limit),
        )(h, w, b)

    out = h[:batch, :num_classes]
    # Activation for the streamed fallback is applied in plain JAX (softmax needs
    # the full class row, which may span output tiles in this path).
    if activation == "sigmoid":
        out = jax.nn.sigmoid(out)
    elif activation == "softmax":
        out = jax.nn.softmax(out, axis=1)
    return out


# --------------------------------------------------------------------------
# Dispatcher
# --------------------------------------------------------------------------
def mlp_forward_pallas(x, padded_params, *, activation: str, num_classes: int,
                       batch_tile: int | None = None, force_layered: bool = False):
    """x: [B, num_features]. padded_params: list of (W_bf16[in_pad,out_pad], b_f32[1,out_pad])."""
    batch, in_dim = x.shape
    in_pad = padded_params[0][0].shape[0]
    out_pad = padded_params[-1][0].shape[1]
    n_layers = len(padded_params)

    # ---- VMEM budget (per-generation) ----
    capacity = _vmem_capacity_bytes()
    budget = min(int(capacity * 0.80), 100 * 1024 * 1024)
    vmem_limit = max(budget, 16 * 1024 * 1024)

    # Resident weight footprint (bf16 weights, f32 biases, single-buffered).
    weight_bytes = sum(int(w.size) * w.dtype.itemsize + int(b.size) * b.dtype.itemsize
                       for w, b in padded_params)
    max_dim = max([in_pad] + [int(w.shape[1]) for w, _ in padded_params])
    # Per batch-row VMEM: double-buffered x/out f32 tiles + widest f32/bf16 intermediate.
    per_row = 2 * 4 * in_pad + 2 * 4 * out_pad + (4 + 2) * max_dim
    left = budget - weight_bytes - (2 << 20)      # 2 MiB headroom for compiler scratch

    fused_fits = (not force_layered) and (left >= per_row * 8)
    if not fused_fits:
        return _mlp_forward_layered(x, padded_params, activation=activation,
                                    num_classes=num_classes, vmem_limit=vmem_limit)

    # ---- batch tile from leftover VMEM (amortize per-step overhead) ----
    b8 = _round_up(batch, 8)
    if batch_tile is not None:
        tb = _round_up(batch_tile, 8)
    else:
        tb_cap = max(8, (left // per_row) // 8 * 8)
        tb = min(512, b8, tb_cap)
        # Keep >= 2 grid steps when the batch allows it (v7x: both TensorCores busy).
        if b8 >= 16:
            tb = min(tb, _round_up(b8 // 2, 8))
    b_pad = _round_up(batch, tb)
    grid = (b_pad // tb,)

    x_p = _pad_input(x, b_pad, in_pad)

    out_specs = pl.BlockSpec((tb, out_pad), lambda i: (i, 0))

    flops = 2 * b_pad * sum(int(w.shape[0]) * int(w.shape[1]) for w, _ in padded_params)
    transcendentals = b_pad * out_pad if activation in ("sigmoid", "softmax") else 0
    bytes_accessed = int(x_p.size) * 4 + weight_bytes + b_pad * out_pad * 4
    cost = pl.CostEstimate(flops=int(flops), transcendentals=int(transcendentals),
                           bytes_accessed=int(bytes_accessed))

    kernel = functools.partial(_mlp_fused_kernel, n_layers=n_layers,
                               activation=activation, num_classes=num_classes)

    flat_inputs = [x_p]
    for (w, b) in padded_params:
        flat_inputs.extend([w, b])

    def build_call(single_buffer_weights: bool):
        wmode = {"pipeline_mode": pl.Buffered(1)} if single_buffer_weights else {}
        in_specs = [pl.BlockSpec((tb, in_pad), lambda i: (i, 0))]
        for (w, _) in padded_params:
            di, do = int(w.shape[0]), int(w.shape[1])
            # constant index_map -> weight/bias blocks stay resident across grid steps
            in_specs.append(pl.BlockSpec((di, do), lambda i: (0, 0), **wmode))
            in_specs.append(pl.BlockSpec((1, do), lambda i: (0, 0), **wmode))
        return pl.pallas_call(
            kernel,
            out_shape=jax.ShapeDtypeStruct((b_pad, out_pad), jnp.float32),
            grid_spec=pltpu.PrefetchScalarGridSpec(
                num_scalar_prefetch=0,
                grid=grid,
                in_specs=in_specs,
                out_specs=out_specs,
            ),
            compiler_params=pltpu.CompilerParams(
                dimension_semantics=("parallel",),   # shard batch tiles across TCs (v7x)
                vmem_limit_bytes=vmem_limit,
            ),
            cost_estimate=cost,
        )

    try:
        out_p = jax.block_until_ready(build_call(True)(*flat_inputs))
    except Exception:
        # Defensive: if Buffered(1) is rejected by this JAX build, use default pipelining.
        out_p = build_call(False)(*flat_inputs)

    return out_p[:batch, :num_classes]


class MLPPallas:
    """JAX/Pallas reimplementation of the torch MLP module.

    forward: x -> Linear_0 -> Linear_1 -> ... -> Linear_L -> activation
    (activation only after the last layer, matching the reference forward()).
    """

    def __init__(self, num_features: int = 2, num_hidden_nodes=(10,),
                 num_classes: int = 2, activation: str = "sigmoid", key=None):
        if isinstance(num_hidden_nodes, int):
            hidden = [num_hidden_nodes]
        else:
            hidden = [int(n) for n in num_hidden_nodes]
        if activation not in ("sigmoid", "linear", "identity", "softmax"):
            raise TypeError(
                "activation not supported, activation should be in "
                "['sigmoid', 'linear', 'identity', 'softmax']")
        self.activation = activation
        self.output_dim = int(num_classes)

        if key is None:
            key = jax.random.PRNGKey(0)
        dims = [int(num_features)] + hidden + [int(num_classes)]
        dims_pad = [_round_up(d, 128) for d in dims]

        self.params = []          # torch-layout (W[out,in], b[out]) f32, for reference
        self._padded_params = []  # kernel layout (W_bf16[in_pad,out_pad], b_f32[1,out_pad])
        for i in range(len(dims) - 1):
            fan_in, fan_out = dims[i], dims[i + 1]
            key, kw, kb = jax.random.split(key, 3)
            bound = 1.0 / jnp.sqrt(fan_in)
            # torch.nn.Linear default init: U(-1/sqrt(fan_in), 1/sqrt(fan_in))
            w = jax.random.uniform(kw, (fan_out, fan_in), jnp.float32, -bound, bound)
            b = jax.random.uniform(kb, (fan_out,), jnp.float32, -bound, bound)
            self.params.append((w, b))

            # Hoisted preprocessing: transpose to [in,out], zero-pad to 128 multiples,
            # store weights in bf16 (accumulation is f32 in the kernel).
            w_pad = (jnp.zeros((dims_pad[i], dims_pad[i + 1]), jnp.float32)
                     .at[:fan_in, :fan_out].set(w.T)).astype(jnp.bfloat16)
            b_pad = (jnp.zeros((1, dims_pad[i + 1]), jnp.float32)
                     .at[0, :fan_out].set(b))
            self._padded_params.append((w_pad, b_pad))

    def __call__(self, x, *, force_layered: bool = False):
        return mlp_forward_pallas(
            x, self._padded_params,
            activation=self.activation, num_classes=self.output_dim,
            force_layered=force_layered)


def _reference_forward(x, params, activation):
    """Plain-JAX f32 reference for correctness check (torch-layout params)."""
    for (w, b) in params:
        x = x @ w.T + b
    if activation == "sigmoid":
        x = 1.0 / (1.0 + jnp.exp(-x))
    elif activation == "softmax":
        x = jax.nn.softmax(x, axis=1)
    return x


if __name__ == "__main__":
    key = jax.random.PRNGKey(0)
    kx, kp = jax.random.split(key)

    batch = 8
    num_features = 32
    num_hidden_nodes = [64, 48]
    num_classes = 16

    x = jax.random.normal(kx, (batch, num_features), jnp.float32)

    # bf16 weights + approx reciprocal -> loosened tolerance vs the f32 reference.
    ATOL = RTOL = 2e-2

    ok = True
    for act in ("sigmoid", "identity", "softmax"):
        model = MLPPallas(
            num_features=num_features,
            num_hidden_nodes=num_hidden_nodes,
            num_classes=num_classes,
            activation=act,
            key=kp,
        )
        out = jax.block_until_ready(model(x))
        ref = _reference_forward(x, model.params, model.activation)
        assert out.shape == (batch, num_classes)
        ok &= bool(jnp.allclose(out, ref, atol=ATOL, rtol=RTOL))

    # Also exercise the tiled per-layer fallback path (used when weights exceed VMEM).
    model = MLPPallas(num_features=num_features, num_hidden_nodes=num_hidden_nodes,
                      num_classes=num_classes, activation="softmax", key=kp)
    out_fb = jax.block_until_ready(model(x, force_layered=True))
    ref_fb = _reference_forward(x, model.params, "softmax")
    ok &= bool(jnp.allclose(out_fb, ref_fb, atol=ATOL, rtol=RTOL))

    assert ok, "mismatch vs reference"
    print("KERNEL_OK")
</pallas_src>

<mosaic_0001>
module attributes {stable_mosaic.version = 11 : i64} {
  func.func @_mlp_fused_kernel(%arg0: i32, %arg1: memref<8x128xf32, #tpu.memory_space<vmem>>, %arg2: memref<128x128xbf16, #tpu.memory_space<vmem>>, %arg3: memref<1x128xf32, #tpu.memory_space<vmem>>, %arg4: memref<128x128xbf16, #tpu.memory_space<vmem>>, %arg5: memref<1x128xf32, #tpu.memory_space<vmem>>, %arg6: memref<128x128xbf16, #tpu.memory_space<vmem>>, %arg7: memref<1x128xf32, #tpu.memory_space<vmem>>, %arg8: memref<8x128xf32, #tpu.memory_space<vmem>>) attributes {dimension_semantics = [#tpu.dimension_semantics<parallel>], iteration_bounds = array<i64: 1>, scalar_prefetch = 0 : i64, scratch_operands = 0 : i64, tpu.core_type = #tpu.core_type<tc>, window_params = [{transform_indices = @transform_0, window_bounds = array<i64: 8, 128>}, {pipeline_mode = #tpu.pipeline_mode<synchronous>, transform_indices = @transform_1, window_bounds = array<i64: 128, 128>}, {pipeline_mode = #tpu.pipeline_mode<synchronous>, transform_indices = @transform_2, window_bounds = array<i64: 1, 128>}, {pipeline_mode = #tpu.pipeline_mode<synchronous>, transform_indices = @transform_3, window_bounds = array<i64: 128, 128>}, {pipeline_mode = #tpu.pipeline_mode<synchronous>, transform_indices = @transform_4, window_bounds = array<i64: 1, 128>}, {pipeline_mode = #tpu.pipeline_mode<synchronous>, transform_indices = @transform_5, window_bounds = array<i64: 128, 128>}, {pipeline_mode = #tpu.pipeline_mode<synchronous>, transform_indices = @transform_6, window_bounds = array<i64: 1, 128>}, {transform_indices = @transform_7, window_bounds = array<i64: 8, 128>}]} {
    %c0 = arith.constant 0 : index
    %c0_0 = arith.constant 0 : index
    %0 = vector.load %arg1[%c0, %c0_0] : memref<8x128xf32, #tpu.memory_space<vmem>>, vector<8x128xf32>
    %c0_1 = arith.constant 0 : index
    %c0_2 = arith.constant 0 : index
    %1 = vector.load %arg2[%c0_1, %c0_2] : memref<128x128xbf16, #tpu.memory_space<vmem>>, vector<128x128xbf16>
    %c0_3 = arith.constant 0 : index
    %c0_4 = arith.constant 0 : index
    %2 = vector.load %arg3[%c0_3, %c0_4] : memref<1x128xf32, #tpu.memory_space<vmem>>, vector<1x128xf32>
    %3 = arith.truncf %0 : vector<8x128xf32> to vector<8x128xbf16>
    %cst = arith.constant dense<0.000000e+00> : vector<8x128xf32>
    %4 = tpu.matmul %3, %1, %cst {dimension_numbers = #tpu.dot_dimension_numbers<[1], [0], [0], [1], [0, 0, 1, 1], [], []>} : vector<8x128xbf16>, vector<128x128xbf16>, vector<8x128xf32> -> vector<8x128xf32>
    %5 = vector.broadcast %2 : vector<1x128xf32> to vector<8x128xf32>
    %6 = arith.addf %4, %5 : vector<8x128xf32>
    %c0_5 = arith.constant 0 : index
    %c0_6 = arith.constant 0 : index
    %7 = vector.load %arg4[%c0_5, %c0_6] : memref<128x128xbf16, #tpu.memory_space<vmem>>, vector<128x128xbf16>
    %c0_7 = arith.constant 0 : index
    %c0_8 = arith.constant 0 : index
    %8 = vector.load %arg5[%c0_7, %c0_8] : memref<1x128xf32, #tpu.memory_space<vmem>>, vector<1x128xf32>
    %9 = arith.truncf %6 : vector<8x128xf32> to vector<8x128xbf16>
    %cst_9 = arith.constant dense<0.000000e+00> : vector<8x128xf32>
    %10 = tpu.matmul %9, %7, %cst_9 {dimension_numbers = #tpu.dot_dimension_numbers<[1], [0], [0], [1], [0, 0, 1, 1], [], []>} : vector<8x128xbf16>, vector<128x128xbf16>, vector<8x128xf32> -> vector<8x128xf32>
    %11 = vector.broadcast %8 : vector<1x128xf32> to vector<8x128xf32>
    %12 = arith.addf %10, %11 : vector<8x128xf32>
    %c0_10 = arith.constant 0 : index
    %c0_11 = arith.constant 0 : index
    %13 = vector.load %arg6[%c0_10, %c0_11] : memref<128x128xbf16, #tpu.memory_space<vmem>>, vector<128x128xbf16>
    %c0_12 = arith.constant 0 : index
    %c0_13 = arith.constant 0 : index
    %14 = vector.load %arg7[%c0_12, %c0_13] : memref<1x128xf32, #tpu.memory_space<vmem>>, vector<1x128xf32>
    %15 = arith.truncf %12 : vector<8x128xf32> to vector<8x128xbf16>
    %cst_14 = arith.constant dense<0.000000e+00> : vector<8x128xf32>
    %16 = tpu.matmul %15, %13, %cst_14 {dimension_numbers = #tpu.dot_dimension_numbers<[1], [0], [0], [1], [0, 0, 1, 1], [], []>} : vector<8x128xbf16>, vector<128x128xbf16>, vector<8x128xf32> -> vector<8x128xf32>
    %17 = vector.broadcast %14 : vector<1x128xf32> to vector<8x128xf32>
    %18 = arith.addf %16, %17 : vector<8x128xf32>
    %cst_15 = arith.constant 0.000000e+00 : f32
    %19 = vector.broadcast %cst_15 : f32 to vector<8x128xf32>
    %20 = arith.subf %19, %18 : vector<8x128xf32>
    %21 = math.exp %20 : vector<8x128xf32>
    %cst_16 = arith.constant 1.000000e+00 : f32
    %22 = vector.broadcast %cst_16 : f32 to vector<8x128xf32>
    %23 = arith.addf %22, %21 : vector<8x128xf32>
    %24 = tpu.reciprocal %23 {approx = true} : vector<8x128xf32> -> vector<8x128xf32>
    %c0_17 = arith.constant 0 : index
    %c0_18 = arith.constant 0 : index
    %25 = vector.load %arg8[%c0_17, %c0_18] : memref<8x128xf32, #tpu.memory_space<vmem>>, vector<8x128xf32>
    tpu.vector_store %arg8[%c0_17, %c0_18], %24 {strides = array<i32>} : memref<8x128xf32, #tpu.memory_space<vmem>>, vector<8x128xf32>,
    return
  }
  func.func @transform_0(%arg0: i32) -> (i32, i32) {
    %c0_i32 = arith.constant 0 : i32
    %c0_i32_0 = arith.constant 0 : i32
    return %arg0, %c0_i32 : i32, i32
  }
  func.func @transform_1(%arg0: i32) -> (i32, i32) {
    %c0_i32 = arith.constant 0 : i32
    %c0_i32_0 = arith.constant 0 : i32
    %c0_i32_1 = arith.constant 0 : i32
    return %c0_i32, %c0_i32_0 : i32, i32
  }
  func.func @transform_2(%arg0: i32) -> (i32, i32) {
    %c0_i32 = arith.constant 0 : i32
    %c0_i32_0 = arith.constant 0 : i32
    %c0_i32_1 = arith.constant 0 : i32
    return %c0_i32, %c0_i32_0 : i32, i32
  }
  func.func @transform_3(%arg0: i32) -> (i32, i32) {
    %c0_i32 = arith.constant 0 : i32
    %c0_i32_0 = arith.constant 0 : i32
    %c0_i32_1 = arith.constant 0 : i32
    return %c0_i32, %c0_i32_0 : i32, i32
  }
  func.func @transform_4(%arg0: i32) -> (i32, i32) {
    %c0_i32 = arith.constant 0 : i32
    %c0_i32_0 = arith.constant 0 : i32
    %c0_i32_1 = arith.constant 0 : i32
    return %c0_i32, %c0_i32_0 : i32, i32
  }
  func.func @transform_5(%arg0: i32) -> (i32, i32) {
    %c0_i32 = arith.constant 0 : i32
    %c0_i32_0 = arith.constant 0 : i32
    %c0_i32_1 = arith.constant 0 : i32
    return %c0_i32, %c0_i32_0 : i32, i32
  }
  func.func @transform_6(%arg0: i32) -> (i32, i32) {
    %c0_i32 = arith.constant 0 : i32
    %c0_i32_0 = arith.constant 0 : i32
    %c0_i32_1 = arith.constant 0 : i32
    return %c0_i32, %c0_i32_0 : i32, i32
  }
  func.func @transform_7(%arg0: i32) -> (i32, i32) {
    %c0_i32 = arith.constant 0 : i32
    %c0_i32_0 = arith.constant 0 : i32
    return %arg0, %c0_i32 : i32, i32
  }
}

module attributes {stable_mosaic.version = 11 : i64} {
  func.func @_mlp_fused_kernel(%arg0: i32, %arg1: memref<8x128xf32, #tpu.memory_space<vmem>>, %arg2: memref<128x128xbf16, #tpu.memory_space<vmem>>, %arg3: memref<1x128xf32, #tpu.memory_space<vmem>>, %arg4: memref<128x128xbf16, #tpu.memory_space<vmem>>, %arg5: memref<1x128xf32, #tpu.memory_space<vmem>>, %arg6: memref<128x128xbf16, #tpu.memory_space<vmem>>, %arg7: memref<1x128xf32, #tpu.memory_space<vmem>>, %arg8: memref<8x128xf32, #tpu.memory_space<vmem>>) attributes {dimension_semantics = [#tpu.dimension_semantics<parallel>], iteration_bounds = array<i64: 1>, scalar_prefetch = 0 : i64, scratch_operands = 0 : i64, tpu.core_type = #tpu.core_type<tc>, window_params = [{transform_indices = @transform_0, window_bounds = array<i64: 8, 128>}, {pipeline_mode = #tpu.pipeline_mode<synchronous>, transform_indices = @transform_1, window_bounds = array<i64: 128, 128>}, {pipeline_mode = #tpu.pipeline_mode<synchronous>, transform_indices = @transform_2, window_bounds = array<i64: 1, 128>}, {pipeline_mode = #tpu.pipeline_mode<synchronous>, transform_indices = @transform_3, window_bounds = array<i64: 128, 128>}, {pipeline_mode = #tpu.pipeline_mode<synchronous>, transform_indices = @transform_4, window_bounds = array<i64: 1, 128>}, {pipeline_mode = #tpu.pipeline_mode<synchronous>, transform_indices = @transform_5, window_bounds = array<i64: 128, 128>}, {pipeline_mode = #tpu.pipeline_mode<synchronous>, transform_indices = @transform_6, window_bounds = array<i64: 1, 128>}, {transform_indices = @transform_7, window_bounds = array<i64: 8, 128>}]} {
    %c0 = arith.constant 0 : index
    %c0_0 = arith.constant 0 : index
    %0 = vector.load %arg1[%c0, %c0_0] : memref<8x128xf32, #tpu.memory_space<vmem>>, vector<8x128xf32>
    %c0_1 = arith.constant 0 : index
    %c0_2 = arith.constant 0 : index
    %1 = vector.load %arg2[%c0_1, %c0_2] : memref<128x128xbf16, #tpu.memory_space<vmem>>, vector<128x128xbf16>
    %c0_3 = arith.constant 0 : index
    %c0_4 = arith.constant 0 : index
    %2 = vector.load %arg3[%c0_3, %c0_4] : memref<1x128xf32, #tpu.memory_space<vmem>>, vector<1x128xf32>
    %3 = arith.truncf %0 : vector<8x128xf32> to vector<8x128xbf16>
    %cst = arith.constant dense<0.000000e+00> : vector<8x128xf32>
    %4 = tpu.matmul %3, %1, %cst {dimension_numbers = #tpu.dot_dimension_numbers<[1], [0], [0], [1], [0, 0, 1, 1], [], []>} : vector<8x128xbf16>, vector<128x128xbf16>, vector<8x128xf32> -> vector<8x128xf32>
    %5 = vector.broadcast %2 : vector<1x128xf32> to vector<8x128xf32>
    %6 = arith.addf %4, %5 : vector<8x128xf32>
    %c0_5 = arith.constant 0 : index
    %c0_6 = arith.constant 0 : index
    %7 = vector.load %arg4[%c0_5, %c0_6] : memref<128x128xbf16, #tpu.memory_space<vmem>>, vector<128x128xbf16>
    %c0_7 = arith.constant 0 : index
    %c0_8 = arith.constant 0 : index
    %8 = vector.load %arg5[%c0_7, %c0_8] : memref<1x128xf32, #tpu.memory_space<vmem>>, vector<1x128xf32>
    %9 = arith.truncf %6 : vector<8x128xf32> to vector<8x128xbf16>
    %cst_9 = arith.constant dense<0.000000e+00> : vector<8x128xf32>
    %10 = tpu.matmul %9, %7, %cst_9 {dimension_numbers = #tpu.dot_dimension_numbers<[1], [0], [0], [1], [0, 0, 1, 1], [], []>} : vector<8x128xbf16>, vector<128x128xbf16>, vector<8x128xf32> -> vector<8x128xf32>
    %11 = vector.broadcast %8 : vector<1x128xf32> to vector<8x128xf32>
    %12 = arith.addf %10, %11 : vector<8x128xf32>
    %c0_10 = arith.constant 0 : index
    %c0_11 = arith.constant 0 : index
    %13 = vector.load %arg6[%c0_10, %c0_11] : memref<128x128xbf16, #tpu.memory_space<vmem>>, vector<128x128xbf16>
    %c0_12 = arith.constant 0 : index
    %c0_13 = arith.constant 0 : index
    %14 = vector.load %arg7[%c0_12, %c0_13] : memref<1x128xf32, #tpu.memory_space<vmem>>, vector<1x128xf32>
    %15 = arith.truncf %12 : vector<8x128xf32> to vector<8x128xbf16>
    %cst_14 = arith.constant dense<0.000000e+00> : vector<8x128xf32>
    %16 = tpu.matmul %15, %13, %cst_14 {dimension_numbers = #tpu.dot_dimension_numbers<[1], [0], [0], [1], [0, 0, 1, 1], [], []>} : vector<8x128xbf16>, vector<128x128xbf16>, vector<8x128xf32> -> vector<8x128xf32>
    %17 = vector.broadcast %14 : vector<1x128xf32> to vector<8x128xf32>
    %18 = arith.addf %16, %17 : vector<8x128xf32>
    %cst_15 = arith.constant 0.000000e+00 : f32
    %19 = vector.broadcast %cst_15 : f32 to vector<8x128xf32>
    %20 = arith.subf %19, %18 : vector<8x128xf32>
    %21 = math.exp %20 : vector<8x128xf32>
    %cst_16 = arith.constant 1.000000e+00 : f32
    %22 = vector.broadcast %cst_16 : f32 to vector<8x128xf32>
    %23 = arith.addf %22, %21 : vector<8x128xf32>
    %24 = tpu.reciprocal %23 {approx = true} : vector<8x128xf32> -> vector<8x128xf32>
    %c0_17 = arith.constant 0 : index
    %c0_18 = arith.constant 0 : index
    %25 = vector.load %arg8[%c0_17, %c0_18] : memref<8x128xf32, #tpu.memory_space<vmem>>, vector<8x128xf32>
    tpu.vector_store %arg8[%c0_17, %c0_18], %24 {strides = array<i32>} : memref<8x128xf32, #tpu.memory_space<vmem>>, vector<8x128xf32>,
    return
  }
  func.func @transform_0(%arg0: i32) -> (i32, i32) {
    %c0_i32 = arith.constant 0 : i32
    %c0_i32_0 = arith.constant 0 : i32
    return %arg0, %c0_i32 : i32, i32
  }
  func.func @transform_1(%arg0: i32) -> (i32, i32) {
    %c0_i32 = arith.constant 0 : i32
    %c0_i32_0 = arith.constant 0 : i32
    %c0_i32_1 = arith.constant 0 : i32
    return %c0_i32, %c0_i32_0 : i32, i32
  }
  func.func @transform_2(%arg0: i32) -> (i32, i32) {
    %c0_i32 = arith.constant 0 : i32
    %c0_i32_0 = arith.constant 0 : i32
    %c0_i32_1 = arith.constant 0 : i32
    return %c0_i32, %c0_i32_0 : i32, i32
  }
  func.func @transform_3(%arg0: i32) -> (i32, i32) {
    %c0_i32 = arith.constant 0 : i32
    %c0_i32_0 = arith.constant 0 : i32
    %c0_i32_1 = arith.constant 0 : i32
    return %c0_i32, %c0_i32_0 : i32, i32
  }
  func.func @transform_4(%arg0: i32) -> (i32, i32) {
    %c0_i32 = arith.constant 0 : i32
    %c0_i32_0 = arith.constant 0 : i32
    %c0_i32_1 = arith.constant 0 : i32
    return %c0_i32, %c0_i32_0 : i32, i32
  }
  func.func @transform_5(%arg0: i32) -> (i32, i32) {
    %c0_i32 = arith.constant 0 : i32
    %c0_i32_0 = arith.constant 0 : i32
    %c0_i32_1 = arith.constant 0 : i32
    return %c0_i32, %c0_i32_0 : i32, i32
  }
  func.func @transform_6(%arg0: i32) -> (i32, i32) {
    %c0_i32 = arith.constant 0 : i32
    %c0_i32_0 = arith.constant 0 : i32
    %c0_i32_1 = arith.constant 0 : i32
    return %c0_i32, %c0_i32_0 : i32, i32
  }
  func.func @transform_7(%arg0: i32) -> (i32, i32) {
    %c0_i32 = arith.constant 0 : i32
    %c0_i32_0 = arith.constant 0 : i32
    return %arg0, %c0_i32 : i32, i32
  }
}

</mosaic_0001>

<bundles_post_ra>
// kernel: tpu_custom_call.1
= control target key start
LH: loop header
LB: loop body
LE: loop exit
PB: predicated region body
PF: predicated region fallthrough
CT: control target
= control target key end

     0   :  { %12 = vsyncpa [#allocation3], 0  ;;  %s812_s0 = inlined_call_operand.hbm [shape: f32[8,128], index: 0, kind: input, shape index: {}]   ;;  %s813_s1 = inlined_call_operand.hbm [shape: bf16[128,128], index: 1, kind: input, shape index: {}]   ;;  %s814_s2 = inlined_call_operand.vmem [shape: f32[1,128], index: 2, kind: input, shape index: {}]   ;;  %s815_s3 = inlined_call_operand.hbm [shape: bf16[128,128], index: 3, kind: input, shape index: {}]   ;;  %s816_s4 = inlined_call_operand.vmem [shape: f32[1,128], index: 4, kind: input, shape index: {}]   ;;  %s817_s5 = inlined_call_operand.hbm [shape: bf16[128,128], index: 5, kind: input, shape index: {}]   ;;  %s818_s6 = inlined_call_operand.vmem [shape: f32[1,128], index: 6, kind: input, shape index: {}]   ;;  %s819_s7 = inlined_call_operand.hbm [shape: f32[8,128], index: 7, kind: output, shape index: {}]  }
   0x1   :  { %13 = vsyncpa [#allocation6], 0 }
   0x2   :  { %14 = vsyncpa [#allocation9], 0 }
   0x3   :  { %15 = vsyncpa [#allocation4], 0  ;;  %s700_s24 = smov [#allocation5]  }
   0x4   :  { %s31_s25 = sshll.u32 %s700_s24, 4  ;;  %s32_s25 = int_to_ptr.vmem [resolvable:$true] %s31_s25 }
   0x5   :  { %s600_s26 = scalar_lea.vmem %s32_s25, 1024  ;;  %p605_p1 = scmp.lt.s32.totalorder %s32_s25, %s32_s25 }
   0x6   :  { %p601_p0 = scmp.ne.s32.totalorder %s32_s25, %s600_s26  ;;  %p606_p2 = scmp.lt.s32.totalorder %s600_s26, %s600_s26 }
   0x8   :  { %p607_p3 = por %p606_p2, %p605_p1 }
   0xa   :  { %p608_p4 = pnand %p607_p3, %p601_p0 }
   0xc   :  { %611 = shalt.err (!%p608_p4)
}
   0xd   :  { %s701_s27 = smov 64   ;;  %s702_s28 = smov 4  }
   0xe   :  { %37 = dma.hbm_to_vmem [thread:$0]  %s813_s1, 1024, %s32_s25, [#allocation6], %s701_s27, %s701_s27, %s702_s28  }
   0xf   :  { %s703_s8 = smov [#allocation2]   ;;  %s704_s10 = smov [#allocation7]  }
  0x10   :  { %s22_s9 = sshll.u32 %s703_s8, 4  ;;  %s45_s11 = sshll.u32 %s704_s10, 4  ;;  %s23_s9 = int_to_ptr.vmem [resolvable:$true] %s22_s9  ;;  %s46_s11 = int_to_ptr.vmem [resolvable:$true] %s45_s11 }
  0x11   :  { %s620_s12 = scalar_lea.vmem %s23_s9, 128  ;;  %p625_p6 = scmp.lt.s32.totalorder %s23_s9, %s23_s9 }
  0x12   :  { %p621_p5 = scmp.ne.s32.totalorder %s23_s9, %s620_s12  ;;  %p626_p7 = scmp.lt.s32.totalorder %s620_s12, %s620_s12 }
  0x14   :  { %p627_p8 = por %p626_p7, %p625_p6 }
  0x16   :  { %p628_p9 = pnand %p627_p8, %p621_p5 }
  0x18   :  { %631 = shalt.err (!%p628_p9)
}
  0x19   :  { %25 = dma.hbm_to_vmem [thread:$0]  %s812_s0, 128, %s23_s9, [#allocation3]  }
  0x1a   :  { %s640_s15 = scalar_lea.vmem %s46_s11, 1024  ;;  %p645_p11 = scmp.lt.s32.totalorder %s46_s11, %s46_s11 }
  0x1b   :  { %p641_p10 = scmp.ne.s32.totalorder %s46_s11, %s640_s15  ;;  %p646_p12 = scmp.lt.s32.totalorder %s640_s15, %s640_s15 }
  0x1d   :  { %p647_p13 = por %p646_p12, %p645_p11 }
  0x1f   :  { %p648_p0 = pnand %p647_p13, %p641_p10 }
  0x21   :  { %651 = shalt.err (!%p648_p0)
}
  0x22   :  { %51 = dma.hbm_to_vmem [thread:$0]  %s815_s3, 1024, %s46_s11, [#allocation6], %s701_s27, %s701_s27, %s702_s28  }
  0x23   :  { %s705_s17 = smov [#allocation8]  }
  0x24   :  { %s59_s18 = sshll.u32 %s705_s17, 4  ;;  %s60_s18 = int_to_ptr.vmem [resolvable:$true] %s59_s18 }
  0x25   :  { %s660_s19 = scalar_lea.vmem %s60_s18, 1024  ;;  %p665_p2 = scmp.lt.s32.totalorder %s60_s18, %s60_s18 }
  0x26   :  { %p661_p1 = scmp.ne.s32.totalorder %s60_s18, %s660_s19  ;;  %p666_p3 = scmp.lt.s32.totalorder %s660_s19, %s660_s19 }
  0x28   :  { %p667_p4 = por %p666_p3, %p665_p2 }
  0x2a   :  { %p668_p5 = pnand %p667_p4, %p661_p1 }
  0x2c   :  { %671 = shalt.err (!%p668_p5)
}
  0x2d   :  { %65 = dma.hbm_to_vmem [thread:$0]  %s817_s5, 1024, %s60_s18, [#allocation9], %s701_s27, %s701_s27, %s702_s28  }
  0x2e   :  { %692 = dma.done.wait [#allocation3], 128  }
  0x2f   :  { %693 = vsyncadd [#allocation3], 4294967168 }
  0x30   :  { %694 = dma.done.wait [#allocation6], 2048  }
  0x31   :  { %695 = vsyncadd [#allocation6], 4294965248 }
  0x32   :  { %696 = dma.done.wait [#allocation9], 1024  }
  0x33   :  { %697 = vsyncadd [#allocation9], 4294966272  ;;  %v706_v0 = vmov 0.0   ;;  %vm707_vm0 = vmmov 0   ;;  %v564_v1 = vld [vmem:[#allocation5 + $0x38] sm:$0xff]   ;;  %v565_v2 = vld [vmem:[#allocation5 + $0x30] sm:$0xff]  }
  0x34   :  { %495 = vmatprep.subr.bf16.mxu0 %v706_v0  ;;  %511 = vmatprep.mubr.msk.bf16.mxu0 %vm707_vm0, %v706_v0  ;;  %v566_v3 = vld [vmem:[#allocation5 + $0x28] sm:$0xff]   ;;  %v572_v4 = vld [vmem:[#allocation7 + $0x38] sm:$0xff]   ;;  %v567_v5 = vld [vmem:[#allocation5 + $0x20] sm:$0xff]  }
  0x35   :  { %515 = vmatprep.subr.bf16.mxu1 %v706_v0  ;;  %531 = vmatprep.mubr.msk.bf16.mxu1 %vm707_vm0, %v706_v0  ;;  %v573_v6 = vld [vmem:[#allocation7 + $0x30] sm:$0xff]   ;;  %v568_v7 = vld [vmem:[#allocation5 + $0x18] sm:$0xff]   ;;  %v574_v8 = vld [vmem:[#allocation7 + $0x28] sm:$0xff]  }
  0x36   :  { %496 = vmatpush3.bf16.msra.mxu0 %v564_v1  ;;  %516 = vmatpush3.bf16.msra.mxu1 %v572_v4  ;;  %v569_v9 = vld [vmem:[#allocation5 + $0x10] sm:$0xff]   ;;  %v575_v10 = vld [vmem:[#allocation7 + $0x20] sm:$0xff]   ;;  %v570_v11 = vld [vmem:[#allocation5 + $0x8] sm:$0xff]  }
  0x37   :  { %497 = vmatprep.subr.bf16.mxu0 %v706_v0  ;;  %517 = vmatprep.subr.bf16.mxu1 %v706_v0  ;;  %v576_v12 = vld [vmem:[#allocation7 + $0x18] sm:$0xff]   ;;  %v571_v13 = vld [vmem:[#allocation5] sm:$0xff]   ;;  %v577_v15 = vld [vmem:[#allocation7 + $0x10] sm:$0xff]  }
  0x38   :  { %v81_v14 = vld [vmem:[#allocation2] sm:$0xff]  ;;  %v578_v17 = vld [vmem:[#allocation7 + $0x8] sm:$0xff]   ;;  %v579_v18 = vld [vmem:[#allocation7] sm:$0xff]  }
  0x39   :  { %v99_v16 = vpack.c.bf16 %v81_v14, %v81_v14  ;;  %v580_v19 = vld [vmem:[#allocation8 + $0x38] sm:$0xff]   ;;  %v581_v20 = vld [vmem:[#allocation8 + $0x30] sm:$0xff]   ;;  %v582_v21 = vld [vmem:[#allocation8 + $0x28] sm:$0xff]  }
  0x3a   :  { %498 = vmatpush3.bf16.msra.mxu0 %v565_v2  ;;  %518 = vmatpush3.bf16.msra.mxu1 %v573_v6  ;;  %v583_v22 = vld [vmem:[#allocation8 + $0x20] sm:$0xff]   ;;  %v584_v23 = vld [vmem:[#allocation8 + $0x18] sm:$0xff]   ;;  %v585_v24 = vld [vmem:[#allocation8 + $0x10] sm:$0xff]  }
  0x3b   :  { %499 = vmatprep.subr.bf16.mxu0 %v706_v0  ;;  %519 = vmatprep.subr.bf16.mxu1 %v706_v0  ;;  %v586_v25 = vld [vmem:[#allocation8 + $0x8] sm:$0xff]   ;;  %v441_v26 = vld [vmem:[%s814_s2] ss:$0 sm:$0xff]  ;;  %v587_v33 = vld [vmem:[#allocation8] sm:$0xff]  }
  0x3c   :  { %v450_v34 = vld [vmem:[%s816_s4] ss:$0 sm:$0xff]  ;;  %s708_s4 = smov [#allocation10]  }
  0x3d   :  { %v459_v41 = vld [vmem:[%s818_s6] ss:$0 sm:$0xff]  ;;  %s430_s24 = sshll.u32 %s708_s4, 4  ;;  %s431_s24 = int_to_ptr.vmem [resolvable:$true] %s430_s24 }
  0x3e   :  { %500 = vmatpush3.bf16.msra.mxu0 %v566_v3  ;;  %520 = vmatpush3.bf16.msra.mxu1 %v574_v8  ;;  %s672_s25 = scalar_lea.vmem %s431_s24, 128  ;;  %p677_p7 = scmp.lt.s32.totalorder %s431_s24, %s431_s24 }
  0x3f   :  { %501 = vmatprep.subr.bf16.mxu0 %v706_v0  ;;  %521 = vmatprep.subr.bf16.mxu1 %v706_v0  ;;  %p673_p6 = scmp.ne.s32.totalorder %s431_s24, %s672_s25  ;;  %p678_p8 = scmp.lt.s32.totalorder %s672_s25, %s672_s25 }
  0x41   :  { %p679_p9 = por %p678_p8, %p677_p7 }
  0x42   :  { %502 = vmatpush3.bf16.msra.mxu0 %v567_v5  ;;  %522 = vmatpush3.bf16.msra.mxu1 %v575_v10 }
  0x43   :  { %503 = vmatprep.subr.bf16.mxu0 %v706_v0  ;;  %523 = vmatprep.subr.bf16.mxu1 %v706_v0  ;;  %p680_p10 = pnand %p679_p9, %p673_p6 }
  0x46   :  { %504 = vmatpush3.bf16.msra.mxu0 %v568_v7  ;;  %524 = vmatpush3.bf16.msra.mxu1 %v576_v12 }
  0x47   :  { %505 = vmatprep.subr.bf16.mxu0 %v706_v0  ;;  %525 = vmatprep.subr.bf16.mxu1 %v706_v0 }
  0x4a   :  { %506 = vmatpush3.bf16.msra.mxu0 %v569_v9  ;;  %526 = vmatpush3.bf16.msra.mxu1 %v577_v15 }
  0x4b   :  { %507 = vmatprep.subr.bf16.mxu0 %v706_v0  ;;  %527 = vmatprep.subr.bf16.mxu1 %v706_v0 }
  0x4e   :  { %508 = vmatpush3.bf16.msra.mxu0 %v570_v11  ;;  %528 = vmatpush3.bf16.msra.mxu1 %v578_v17 }
  0x4f   :  { %509 = vmatprep.subr.bf16.mxu0 %v706_v0  ;;  %529 = vmatprep.subr.bf16.mxu1 %v706_v0 }
  0x52   :  { %510 = vmatpush3.bf16.msra.mxu0 %v571_v13  ;;  %530 = vmatpush3.bf16.msra.mxu1 %v579_v18 }
  0x53   :  { %535 = vmatprep.subr.bf16.mxu0 %v706_v0 }
  0x55   :  { %512 = vmatmul.mubr.bf16.vlgmr.msra.gmra.mxu0 %v99_v16 }
  0x56   :  { %551 = vmatprep.mubr.msk.bf16.mxu0 %vm707_vm0, %v706_v0  ;;  %536 = vmatpush3.bf16.msra.mxu0 %v580_v19 }
  0x57   :  { %537 = vmatprep.subr.bf16.mxu0 %v706_v0 }
  0x5a   :  { %538 = vmatpush3.bf16.msra.mxu0 %v581_v20 }
  0x5b   :  { %539 = vmatprep.subr.bf16.mxu0 %v706_v0 }
  0x5e   :  { %540 = vmatpush3.bf16.msra.mxu0 %v582_v21 }
  0x5f   :  { %541 = vmatprep.subr.bf16.mxu0 %v706_v0 }
  0x62   :  { %542 = vmatpush3.bf16.msra.mxu0 %v583_v22 }
  0x63   :  { %543 = vmatprep.subr.bf16.mxu0 %v706_v0 }
  0x66   :  { %544 = vmatpush3.bf16.msra.mxu0 %v584_v23 }
  0x67   :  { %545 = vmatprep.subr.bf16.mxu0 %v706_v0 }
  0x6a   :  { %546 = vmatpush3.bf16.msra.mxu0 %v585_v24 }
  0x6b   :  { %547 = vmatprep.subr.bf16.mxu0 %v706_v0 }
  0x6e   :  { %548 = vmatpush3.bf16.msra.mxu0 %v586_v25 }
  0x6f   :  { %549 = vmatprep.subr.bf16.mxu0 %v706_v0 }
  0x72   :  { %550 = vmatpush3.bf16.msra.mxu0 %v587_v33 }
 0x115   :  { %v188_v27 = vpop.f32.mrf.mxu0 }
 0x116   :  { %v189_v28 = vadd.f32 %v441_v26, %v188_v27 }
 0x117   :  { %v513_v29 = vpop.f32.mrf.mxu0 }
 0x118   :  { %v211_v30 = vpack.c.bf16 %v189_v28, %v189_v28 }
 0x119   :  { %v191_v31 = vpop.f32.mrf.mxu0 }
 0x11a   :  { %532 = vmatmul.mubr.bf16.vlgmr.msra.gmra.mxu1 %v211_v30 }
 0x11b   :  { %v514_v32 = vpop.f32.mrf.mxu0 }
 0x1da   :  { %v300_v35 = vpop.f32.mrf.mxu1 }
 0x1db   :  { %v301_v36 = vadd.f32 %v450_v34, %v300_v35 }
 0x1dc   :  { %v533_v37 = vpop.f32.mrf.mxu1 }
 0x1dd   :  { %v323_v38 = vpack.c.bf16 %v301_v36, %v301_v36 }
 0x1de   :  { %v303_v39 = vpop.f32.mrf.mxu1 }
 0x1df   :  { %552 = vmatmul.mubr.bf16.vlgmr.msra.gmra.mxu0 %v323_v38 }
 0x1e0   :  { %v534_v40 = vpop.f32.mrf.mxu1 }
 0x29f   :  { %v412_v42 = vpop.f32.mrf.mxu0 }
 0x2a0   :  { %v413_v43 = vadd.f32 %v459_v41, %v412_v42 }
 0x2a1   :  { %v553_v44 = vpop.f32.mrf.mxu0 }
 0x2a2   :  { %v418_v45 = vsub.f32 0.0, %v413_v43 }
 0x2a3   :  { %v415_v46 = vpop.f32.mrf.mxu0 }
 0x2a4   :  { %v419_v47 = vmul.f32 1.442695, %v418_v45 }
 0x2a5   :  { %v554_v48 = vpop.f32.mrf.mxu0 }
 0x2a6   :  { %588 = vpow2.f32 %v419_v47 }
 0x2b3   :  { %v589_v49 = vpop.eup %588 }
 0x2b4   :  { %v421_v50 = vadd.f32 1.0, %v589_v49 }
 0x2b6   :  { %590 = vrcp.f32 %v421_v50 }
 0x2c3   :  { %v591_v51 = vpop.eup %590 }
 0x2c4   :  { %423 = vst [vmem:[#allocation10] sm:$0xff] %v591_v51 }
 0x2c5   :  { %683 = shalt.err (!%p680_p10)
}
 0x2c6   :  { %433 = dma.vmem_to_hbm [thread:$0]  %s431_s24, 128, %s819_s7, [#allocation4]  }
 0x2c7   :  { %698 = dma.done.wait [#allocation4], 128  }
 0x2c8   :  { %699 = vsyncadd [#allocation4], 4294967168 }
 0x2c9   :  { %437 = vsyncpa [#allocation3], 1 }
 0x2ca   :  { %438 = vsyncpa [#allocation6], 1 }
 0x2cb   :  { %439 = vsyncpa [#allocation9], 1 }
 0x2cc   :  { %440 = vsyncpa [#allocation4], 1 }

// kernel: tpu_custom_call.1
= control target key start
LH: loop header
LB: loop body
LE: loop exit
PB: predicated region body
PF: predicated region fallthrough
CT: control target
= control target key end

     0   :  { %12 = vsyncpa [#allocation3], 0  ;;  %s812_s0 = inlined_call_operand.hbm [shape: f32[8,128], index: 0, kind: input, shape index: {}]   ;;  %s813_s1 = inlined_call_operand.hbm [shape: bf16[128,128], index: 1, kind: input, shape index: {}]   ;;  %s814_s2 = inlined_call_operand.vmem [shape: f32[1,128], index: 2, kind: input, shape index: {}]   ;;  %s815_s3 = inlined_call_operand.hbm [shape: bf16[128,128], index: 3, kind: input, shape index: {}]   ;;  %s816_s4 = inlined_call_operand.vmem [shape: f32[1,128], index: 4, kind: input, shape index: {}]   ;;  %s817_s5 = inlined_call_operand.hbm [shape: bf16[128,128], index: 5, kind: input, shape index: {}]   ;;  %s818_s6 = inlined_call_operand.vmem [shape: f32[1,128], index: 6, kind: input, shape index: {}]   ;;  %s819_s7 = inlined_call_operand.hbm [shape: f32[8,128], index: 7, kind: output, shape index: {}]  }
   0x1   :  { %13 = vsyncpa [#allocation6], 0 }
   0x2   :  { %14 = vsyncpa [#allocation9], 0 }
   0x3   :  { %15 = vsyncpa [#allocation4], 0  ;;  %s700_s24 = smov [#allocation5]  }
   0x4   :  { %s31_s25 = sshll.u32 %s700_s24, 4  ;;  %s32_s25 = int_to_ptr.vmem [resolvable:$true] %s31_s25 }
   0x5   :  { %s600_s26 = scalar_lea.vmem %s32_s25, 1024  ;;  %p605_p1 = scmp.lt.s32.totalorder %s32_s25, %s32_s25 }
   0x6   :  { %p601_p0 = scmp.ne.s32.totalorder %s32_s25, %s600_s26  ;;  %p606_p2 = scmp.lt.s32.totalorder %s600_s26, %s600_s26 }
   0x8   :  { %p607_p3 = por %p606_p2, %p605_p1 }
   0xa   :  { %p608_p4 = pnand %p607_p3, %p601_p0 }
   0xc   :  { %611 = shalt.err (!%p608_p4)
}
   0xd   :  { %s701_s27 = smov 64   ;;  %s702_s28 = smov 4  }
   0xe   :  { %37 = dma.hbm_to_vmem [thread:$0]  %s813_s1, 1024, %s32_s25, [#allocation6], %s701_s27, %s701_s27, %s702_s28  }
   0xf   :  { %s703_s8 = smov [#allocation2]   ;;  %s704_s10 = smov [#allocation7]  }
  0x10   :  { %s22_s9 = sshll.u32 %s703_s8, 4  ;;  %s45_s11 = sshll.u32 %s704_s10, 4  ;;  %s23_s9 = int_to_ptr.vmem [resolvable:$true] %s22_s9  ;;  %s46_s11 = int_to_ptr.vmem [resolvable:$true] %s45_s11 }
  0x11   :  { %s620_s12 = scalar_lea.vmem %s23_s9, 128  ;;  %p625_p6 = scmp.lt.s32.totalorder %s23_s9, %s23_s9 }
  0x12   :  { %p621_p5 = scmp.ne.s32.totalorder %s23_s9, %s620_s12  ;;  %p626_p7 = scmp.lt.s32.totalorder %s620_s12, %s620_s12 }
  0x14   :  { %p627_p8 = por %p626_p7, %p625_p6 }
  0x16   :  { %p628_p9 = pnand %p627_p8, %p621_p5 }
  0x18   :  { %631 = shalt.err (!%p628_p9)
}
  0x19   :  { %25 = dma.hbm_to_vmem [thread:$0]  %s812_s0, 128, %s23_s9, [#allocation3]  }
  0x1a   :  { %s640_s15 = scalar_lea.vmem %s46_s11, 1024  ;;  %p645_p11 = scmp.lt.s32.totalorder %s46_s11, %s46_s11 }
  0x1b   :  { %p641_p10 = scmp.ne.s32.totalorder %s46_s11, %s640_s15  ;;  %p646_p12 = scmp.lt.s32.totalorder %s640_s15, %s640_s15 }
  0x1d   :  { %p647_p13 = por %p646_p12, %p645_p11 }
  0x1f   :  { %p648_p0 = pnand %p647_p13, %p641_p10 }
  0x21   :  { %651 = shalt.err (!%p648_p0)
}
  0x22   :  { %51 = dma.hbm_to_vmem [thread:$0]  %s815_s3, 1024, %s46_s11, [#allocation6], %s701_s27, %s701_s27, %s702_s28  }
  0x23   :  { %s705_s17 = smov [#allocation8]  }
  0x24   :  { %s59_s18 = sshll.u32 %s705_s17, 4  ;;  %s60_s18 = int_to_ptr.vmem [resolvable:$true] %s59_s18 }
  0x25   :  { %s660_s19 = scalar_lea.vmem %s60_s18, 1024  ;;  %p665_p2 = scmp.lt.s32.totalorder %s60_s18, %s60_s18 }
  0x26   :  { %p661_p1 = scmp.ne.s32.totalorder %s60_s18, %s660_s19  ;;  %p666_p3 = scmp.lt.s32.totalorder %s660_s19, %s660_s19 }
  0x28   :  { %p667_p4 = por %p666_p3, %p665_p2 }
  0x2a   :  { %p668_p5 = pnand %p667_p4, %p661_p1 }
  0x2c   :  { %671 = shalt.err (!%p668_p5)
}
  0x2d   :  { %65 = dma.hbm_to_vmem [thread:$0]  %s817_s5, 1024, %s60_s18, [#allocation9], %s701_s27, %s701_s27, %s702_s28  }
  0x2e   :  { %692 = dma.done.wait [#allocation3], 128  }
  0x2f   :  { %693 = vsyncadd [#allocation3], 4294967168 }
  0x30   :  { %694 = dma.done.wait [#allocation6], 2048  }
  0x31   :  { %695 = vsyncadd [#allocation6], 4294965248 }
  0x32   :  { %696 = dma.done.wait [#allocation9], 1024  }
  0x33   :  { %697 = vsyncadd [#allocation9], 4294966272  ;;  %v706_v0 = vmov 0.0   ;;  %vm707_vm0 = vmmov 0   ;;  %v564_v1 = vld [vmem:[#allocation5 + $0x38] sm:$0xff]   ;;  %v565_v2 = vld [vmem:[#allocation5 + $0x30] sm:$0xff]  }
  0x34   :  { %495 = vmatprep.subr.bf16.mxu0 %v706_v0  ;;  %511 = vmatprep.mubr.msk.bf16.mxu0 %vm707_vm0, %v706_v0  ;;  %v566_v3 = vld [vmem:[#allocation5 + $0x28] sm:$0xff]   ;;  %v572_v4 = vld [vmem:[#allocation7 + $0x38] sm:$0xff]   ;;  %v567_v5 = vld [vmem:[#allocation5 + $0x20] sm:$0xff]  }
  0x35   :  { %515 = vmatprep.subr.bf16.mxu1 %v706_v0  ;;  %531 = vmatprep.mubr.msk.bf16.mxu1 %vm707_vm0, %v706_v0  ;;  %v573_v6 = vld [vmem:[#allocation7 + $0x30] sm:$0xff]   ;;  %v568_v7 = vld [vmem:[#allocation5 + $0x18] sm:$0xff]   ;;  %v574_v8 = vld [vmem:[#allocation7 + $0x28] sm:$0xff]  }
  0x36   :  { %496 = vmatpush3.bf16.msra.mxu0 %v564_v1  ;;  %516 = vmatpush3.bf16.msra.mxu1 %v572_v4  ;;  %v569_v9 = vld [vmem:[#allocation5 + $0x10] sm:$0xff]   ;;  %v575_v10 = vld [vmem:[#allocation7 + $0x20] sm:$0xff]   ;;  %v570_v11 = vld [vmem:[#allocation5 + $0x8] sm:$0xff]  }
  0x37   :  { %497 = vmatprep.subr.bf16.mxu0 %v706_v0  ;;  %517 = vmatprep.subr.bf16.mxu1 %v706_v0  ;;  %v576_v12 = vld [vmem:[#allocation7 + $0x18] sm:$0xff]   ;;  %v571_v13 = vld [vmem:[#allocation5] sm:$0xff]   ;;  %v577_v15 = vld [vmem:[#allocation7 + $0x10] sm:$0xff]  }
  0x38   :  { %v81_v14 = vld [vmem:[#allocation2] sm:$0xff]  ;;  %v578_v17 = vld [vmem:[#allocation7 + $0x8] sm:$0xff]   ;;  %v579_v18 = vld [vmem:[#allocation7] sm:$0xff]  }
  0x39   :  { %v99_v16 = vpack.c.bf16 %v81_v14, %v81_v14  ;;  %v580_v19 = vld [vmem:[#allocation8 + $0x38] sm:$0xff]   ;;  %v581_v20 = vld [vmem:[#allocation8 + $0x30] sm:$0xff]   ;;  %v582_v21 = vld [vmem:[#allocation8 + $0x28] sm:$0xff]  }
  0x3a   :  { %498 = vmatpush3.bf16.msra.mxu0 %v565_v2  ;;  %518 = vmatpush3.bf16.msra.mxu1 %v573_v6  ;;  %v583_v22 = vld [vmem:[#allocation8 + $0x20] sm:$0xff]   ;;  %v584_v23 = vld [vmem:[#allocation8 + $0x18] sm:$0xff]   ;;  %v585_v24 = vld [vmem:[#allocation8 + $0x10] sm:$0xff]  }
  0x3b   :  { %499 = vmatprep.subr.bf16.mxu0 %v706_v0  ;;  %519 = vmatprep.subr.bf16.mxu1 %v706_v0  ;;  %v586_v25 = vld [vmem:[#allocation8 + $0x8] sm:$0xff]   ;;  %v441_v26 = vld [vmem:[%s814_s2] ss:$0 sm:$0xff]  ;;  %v587_v33 = vld [vmem:[#allocation8] sm:$0xff]  }
  0x3c   :  { %v450_v34 = vld [vmem:[%s816_s4] ss:$0 sm:$0xff]  ;;  %s708_s4 = smov [#allocation10]  }
  0x3d   :  { %v459_v41 = vld [vmem:[%s818_s6] ss:$0 sm:$0xff]  ;;  %s430_s24 = sshll.u32 %s708_s4, 4  ;;  %s431_s24 = int_to_ptr.vmem [resolvable:$true] %s430_s24 }
  0x3e   :  { %500 = vmatpush3.bf16.msra.mxu0 %v566_v3  ;;  %520 = vmatpush3.bf16.msra.mxu1 %v574_v8  ;;  %s672_s25 = scalar_lea.vmem %s431_s24, 128  ;;  %p677_p7 = scmp.lt.s32.totalorder %s431_s24, %s431_s24 }
  0x3f   :  { %501 = vmatprep.subr.bf16.mxu0 %v706_v0  ;;  %521 = vmatprep.subr.bf16.mxu1 %v706_v0  ;;  %p673_p6 = scmp.ne.s32.totalorder %s431_s24, %s672_s25  ;;  %p678_p8 = scmp.lt.s32.totalorder %s672_s25, %s672_s25 }
  0x41   :  { %p679_p9 = por %p678_p8, %p677_p7 }
  0x42   :  { %502 = vmatpush3.bf16.msra.mxu0 %v567_v5  ;;  %522 = vmatpush3.bf16.msra.mxu1 %v575_v10 }
  0x43   :  { %503 = vmatprep.subr.bf16.mxu0 %v706_v0  ;;  %523 = vmatprep.subr.bf16.mxu1 %v706_v0  ;;  %p680_p10 = pnand %p679_p9, %p673_p6 }
  0x46   :  { %504 = vmatpush3.bf16.msra.mxu0 %v568_v7  ;;  %524 = vmatpush3.bf16.msra.mxu1 %v576_v12 }
  0x47   :  { %505 = vmatprep.subr.bf16.mxu0 %v706_v0  ;;  %525 = vmatprep.subr.bf16.mxu1 %v706_v0 }
  0x4a   :  { %506 = vmatpush3.bf16.msra.mxu0 %v569_v9  ;;  %526 = vmatpush3.bf16.msra.mxu1 %v577_v15 }
  0x4b   :  { %507 = vmatprep.subr.bf16.mxu0 %v706_v0  ;;  %527 = vmatprep.subr.bf16.mxu1 %v706_v0 }
  0x4e   :  { %508 = vmatpush3.bf16.msra.mxu0 %v570_v11  ;;  %528 = vmatpush3.bf16.msra.mxu1 %v578_v17 }
  0x4f   :  { %509 = vmatprep.subr.bf16.mxu0 %v706_v0  ;;  %529 = vmatprep.subr.bf16.mxu1 %v706_v0 }
  0x52   :  { %510 = vmatpush3.bf16.msra.mxu0 %v571_v13  ;;  %530 = vmatpush3.bf16.msra.mxu1 %v579_v18 }
  0x53   :  { %535 = vmatprep.subr.bf16.mxu0 %v706_v0 }
  0x55   :  { %512 = vmatmul.mubr.bf16.vlgmr.msra.gmra.mxu0 %v99_v16 }
  0x56   :  { %551 = vmatprep.mubr.msk.bf16.mxu0 %vm707_vm0, %v706_v0  ;;  %536 = vmatpush3.bf16.msra.mxu0 %v580_v19 }
  0x57   :  { %537 = vmatprep.subr.bf16.mxu0 %v706_v0 }
  0x5a   :  { %538 = vmatpush3.bf16.msra.mxu0 %v581_v20 }
  0x5b   :  { %539 = vmatprep.subr.bf16.mxu0 %v706_v0 }
  0x5e   :  { %540 = vmatpush3.bf16.msra.mxu0 %v582_v21 }
  0x5f   :  { %541 = vmatprep.subr.bf16.mxu0 %v706_v0 }
  0x62   :  { %542 = vmatpush3.bf16.msra.mxu0 %v583_v22 }
  0x63   :  { %543 = vmatprep.subr.bf16.mxu0 %v706_v0 }
  0x66   :  { %544 = vmatpush3.bf16.msra.mxu0 %v584_v23 }
  0x67   :  { %545 = vmatprep.subr.bf16.mxu0 %v706_v0 }
  0x6a   :  { %546 = vmatpush3.bf16.msra.mxu0 %v585_v24 }
  0x6b   :  { %547 = vmatprep.subr.bf16.mxu0 %v706_v0 }
  0x6e   :  { %548 = vmatpush3.bf16.msra.mxu0 %v586_v25 }
  0x6f   :  { %549 = vmatprep.subr.bf16.mxu0 %v706_v0 }
  0x72   :  { %550 = vmatpush3.bf16.msra.mxu0 %v587_v33 }
 0x115   :  { %v188_v27 = vpop.f32.mrf.mxu0 }
 0x116   :  { %v189_v28 = vadd.f32 %v441_v26, %v188_v27 }
 0x117   :  { %v513_v29 = vpop.f32.mrf.mxu0 }
 0x118   :  { %v211_v30 = vpack.c.bf16 %v189_v28, %v189_v28 }
 0x119   :  { %v191_v31 = vpop.f32.mrf.mxu0 }
 0x11a   :  { %532 = vmatmul.mubr.bf16.vlgmr.msra.gmra.mxu1 %v211_v30 }
 0x11b   :  { %v514_v32 = vpop.f32.mrf.mxu0 }
 0x1da   :  { %v300_v35 = vpop.f32.mrf.mxu1 }
 0x1db   :  { %v301_v36 = vadd.f32 %v450_v34, %v300_v35 }
 0x1dc   :  { %v533_v37 = vpop.f32.mrf.mxu1 }
 0x1dd   :  { %v323_v38 = vpack.c.bf16 %v301_v36, %v301_v36 }
 0x1de   :  { %v303_v39 = vpop.f32.mrf.mxu1 }
 0x1df   :  { %552 = vmatmul.mubr.bf16.vlgmr.msra.gmra.mxu0 %v323_v38 }
 0x1e0   :  { %v534_v40 = vpop.f32.mrf.mxu1 }
 0x29f   :  { %v412_v42 = vpop.f32.mrf.mxu0 }
 0x2a0   :  { %v413_v43 = vadd.f32 %v459_v41, %v412_v42 }
 0x2a1   :  { %v553_v44 = vpop.f32.mrf.mxu0 }
 0x2a2   :  { %v418_v45 = vsub.f32 0.0, %v413_v43 }
 0x2a3   :  { %v415_v46 = vpop.f32.mrf.mxu0 }
 0x2a4   :  { %v419_v47 = vmul.f32 1.442695, %v418_v45 }
 0x2a5   :  { %v554_v48 = vpop.f32.mrf.mxu0 }
 0x2a6   :  { %588 = vpow2.f32 %v419_v47 }
 0x2b3   :  { %v589_v49 = vpop.eup %588 }
 0x2b4   :  { %v421_v50 = vadd.f32 1.0, %v589_v49 }
 0x2b6   :  { %590 = vrcp.f32 %v421_v50 }
 0x2c3   :  { %v591_v51 = vpop.eup %590 }
 0x2c4   :  { %423 = vst [vmem:[#allocation10] sm:$0xff] %v591_v51 }
 0x2c5   :  { %683 = shalt.err (!%p680_p10)
}
 0x2c6   :  { %433 = dma.vmem_to_hbm [thread:$0]  %s431_s24, 128, %s819_s7, [#allocation4]  }
 0x2c7   :  { %698 = dma.done.wait [#allocation4], 128  }
 0x2c8   :  { %699 = vsyncadd [#allocation4], 4294967168 }
 0x2c9   :  { %437 = vsyncpa [#allocation3], 1 }
 0x2ca   :  { %438 = vsyncpa [#allocation6], 1 }
 0x2cb   :  { %439 = vsyncpa [#allocation9], 1 }
 0x2cc   :  { %440 = vsyncpa [#allocation4], 1 }

</bundles_post_ra>
